<compile_context>
chip_gen: v6e
topology: v6e:2x2x1
jax: 0.10.0
libtpu: 0.0.40
codegen_flags: <defaults>
</compile_context>

<pallas_src>
import math

import jax
import jax.numpy as jnp
import numpy as np
from jax.experimental import pallas as pl
from jax.experimental.pallas import tpu as pltpu


def _round_up(v, m):
    return (v + m - 1) // m * m


def make_rainbow_kernel(n_trunk, n_branch_hidden):
    """Kernel ref order:
       x, (W,b)*n_trunk, (W,b)*n_branch_hidden (fused value|adv),
       (W_final, b_final) (value-replicated + centered adv, padded),
       seg (block-diag segment-sum matrix), out_ref.
    """

    def kernel(*refs):
        pos = 0

        def take():
            nonlocal pos
            r = refs[pos]
            pos += 1
            return r

        x = take()[...]

        # ---- trunk: Linear + ReLU each ----
        for _ in range(n_trunk):
            w, b = take()[...], take()[...]
            x = jnp.maximum(
                jnp.dot(x, w, preferred_element_type=jnp.float32) + b, 0.0
            )

        # ---- fused [value | advantage] hidden layers (first one ReLU'd) ----
        h = x
        for i in range(n_branch_hidden):
            w, b = take()[...], take()[...]
            h = jnp.dot(h, w, preferred_element_type=jnp.float32) + b
            if i == 0:
                h = jnp.maximum(h, 0.0)

        # ---- final fused layer: q_j = v + (adv_j - mean_k adv_k), one matmul ----
        wf, bf = take()[...], take()[...]
        seg = take()[...]
        out_ref = take()
        q = jnp.dot(h, wf, preferred_element_type=jnp.float32) + bf  # (Bb, AN_pad)

        # ---- vectorized per-action softmax over atoms ----
        # Single per-row max as the stabilizer: it cancels exactly in each
        # segment's exp/sum ratio, so the result equals a per-segment softmax.
        # (Padded columns have bias -1e9, so they never win the max and their
        # exp is exactly 0.)  Underflow could only matter if q values across
        # actions within one row differed by ~80+, which dueling (shared value
        # + centered advantage) makes implausible.
        m = jnp.max(q, axis=-1, keepdims=True)          # 1 XLU row reduce
        e = jnp.exp(q - m)                              # 1 EUP chain, whole slab
        # Per-lane segment denominators via one tiny matmul (MXU has slack).
        denom = jnp.dot(e, seg, preferred_element_type=jnp.float32)
        # Exact reciprocal (review: approx=True removed — free accuracy here).
        # Clamp keeps padded lanes (denom == 0) finite; they are sliced off host-side.
        out_ref[...] = e * pl.reciprocal(jnp.maximum(denom, 1e-30))

    return kernel


def init_params(key, num_inputs, hidden_before, hidden_after, num_actions, num_atoms):
    """PyTorch-style (uniform +/- 1/sqrt(fan_in)) init of the RAW per-layer params.

    Returns flat list [W1, b1, W2, b2, ...] in module order:
    trunk, value branch (len(hidden_after)+1 layers), advantage branch.
    Weights are (in_dim, out_dim); biases are (1, out_dim).
    """
    layer_dims = []
    pre = num_inputs
    for h in hidden_before:
        layer_dims.append((pre, h))
        pre = h
    trunk_out = pre
    # value branch
    pre = trunk_out
    for h in hidden_after:
        layer_dims.append((pre, h))
        pre = h
    layer_dims.append((pre, num_atoms))
    # advantage branch
    pre = trunk_out
    for h in hidden_after:
        layer_dims.append((pre, h))
        pre = h
    layer_dims.append((pre, num_actions * num_atoms))

    flat = []
    for (din, dout) in layer_dims:
        key, kw, kb = jax.random.split(key, 3)
        bound = 1.0 / math.sqrt(din)
        w = jax.random.uniform(kw, (din, dout), jnp.float32, -bound, bound)
        b = jax.random.uniform(kb, (1, dout), jnp.float32, -bound, bound)
        flat += [w, b]
    return flat


def pack_params(raw_params, hidden_before, hidden_after, num_actions, num_atoms,
                num_inputs):
    """Host-side transform of raw per-layer params into the fused, lane-padded
    kernel params.  Returns a flat list ending with the constant segment-sum
    matrix used by the vectorized softmax."""
    it = iter(raw_params)

    def nxt():
        return next(it), next(it)

    fused = []  # list of (W, b) in chain order (unpadded)
    for _ in hidden_before:
        fused.append(nxt())

    n_after = len(hidden_after)
    v_layers = [nxt() for _ in range(n_after + 1)]
    a_layers = [nxt() for _ in range(n_after + 1)]

    # Fuse branch hidden layers: layer 0 shares the trunk input (concat along
    # the output dim); later layers operate on [vh | ah] so they are block-diag.
    for i in range(n_after):
        wv, bv = v_layers[i]
        wa, ba = a_layers[i]
        if i == 0:
            w = jnp.concatenate([wv, wa], axis=1)
        else:
            top = jnp.concatenate(
                [wv, jnp.zeros((wv.shape[0], wa.shape[1]), wv.dtype)], axis=1)
            bot = jnp.concatenate(
                [jnp.zeros((wa.shape[0], wv.shape[1]), wa.dtype), wa], axis=1)
            w = jnp.concatenate([top, bot], axis=0)
        b = jnp.concatenate([bv, ba], axis=1)
        fused.append((w, b))

    # Final fused layer: replicate the value head per action and fold the
    # dueling mean-centering into the advantage weights/bias.
    A, N = num_actions, num_atoms
    wvf, bvf = v_layers[n_after]          # (hv, N), (1, N)
    waf, baf = a_layers[n_after]          # (ha, A*N), (1, A*N)
    ha = waf.shape[0]
    wa3 = waf.reshape(ha, A, N)
    wa3 = wa3 - wa3.mean(axis=1, keepdims=True)
    ba3 = baf.reshape(1, A, N)
    ba3 = ba3 - ba3.mean(axis=1, keepdims=True)
    w_final = jnp.concatenate(
        [jnp.tile(wvf, (1, A)), wa3.reshape(ha, A * N)], axis=0)   # (hv+ha, A*N)
    b_final = (bvf.reshape(1, 1, N) + ba3).reshape(1, A * N)
    fused.append((w_final, b_final))

    # Pad every layer to lane-dense widths (multiples of 128 on the output dim,
    # input dim matched to the previous layer's padded output).  Zero weights /
    # zero biases keep padded lanes at exactly 0 through the ReLU chain; the
    # FINAL bias pad is -1e9 so padded q columns exp() to exactly 0.
    packed = []
    prev_out_pad = num_inputs          # x itself is not padded (full-dim block)
    n_layers = len(fused)
    for li, (w, b) in enumerate(fused):
        din, dout = w.shape
        dout_pad = _round_up(dout, 128)
        din_pad = prev_out_pad
        pad_bias = -1e9 if li == n_layers - 1 else 0.0
        w_p = jnp.zeros((din_pad, dout_pad), w.dtype).at[:din, :dout].set(w)
        b_p = jnp.full((1, dout_pad), pad_bias, b.dtype).at[:, :dout].set(b)
        packed += [w_p, b_p]
        prev_out_pad = dout_pad

    # Constant block-diagonal "segment-sum" matrix: one matmul against it gives
    # every lane the softmax denominator of its own action's atom segment.
    AN_pad = prev_out_pad
    seg = np.zeros((AN_pad, AN_pad), np.float32)
    for j in range(A):
        seg[j * N:(j + 1) * N, j * N:(j + 1) * N] = 1.0
    packed.append(jnp.asarray(seg))
    return packed


def _choose_block_b(B):
    """Batch block: sublane-aligned; multiples of 256 (full MXU M passes on
    v6e/v7x) for large batches, grown to keep grid-step count modest while
    guaranteeing >=2 parallel steps so v7x's second TensorCore is used."""
    B8 = _round_up(B, 8)
    if B8 <= 256:
        return B8
    block_b = 256
    while B8 // block_b > 8 and block_b < 2048:
        block_b *= 2
    return block_b


def rainbow_forward(x, packed_params, hidden_before, hidden_after,
                    num_actions, num_atoms):
    assert num_atoms > 1      # TODO(synk): scalar-Q (num_atoms == 1) branch not implemented
    assert len(hidden_after) >= 1  # TODO(synk): empty hidden_after (ReLU on heads) prevents the centering fold

    B, F_in = x.shape
    AN = num_actions * num_atoms
    AN_pad = packed_params[-1].shape[0]    # segment matrix is (AN_pad, AN_pad)

    block_b = _choose_block_b(B)
    B_pad = _round_up(_round_up(B, 8), block_b)
    if B_pad != B:
        x = jnp.pad(x, ((0, B_pad - B), (0, 0)))

    kernel = make_rainbow_kernel(len(hidden_before), len(hidden_after))

    in_specs = [pl.BlockSpec((block_b, F_in), lambda i: (i, 0))]
    for p in packed_params:
        in_specs.append(
            pl.BlockSpec(p.shape, lambda i, nd=p.ndim: (0,) * nd))

    out = pl.pallas_call(
        kernel,
        out_shape=jax.ShapeDtypeStruct((B_pad, AN_pad), jnp.float32),
        grid=(B_pad // block_b,),
        in_specs=in_specs,
        out_specs=pl.BlockSpec((block_b, AN_pad), lambda i: (i, 0)),
        compiler_params=pltpu.CompilerParams(
            dimension_semantics=("parallel",)),
    )(x, *packed_params)

    # Lane-dense padded slab -> PyTorch convention (host-side slice + reshape).
    return out[:B, :AN].reshape(B, num_actions, num_atoms)


def rainbow_forward_ref(x, raw_params, hidden_before, hidden_after,
                        num_actions, num_atoms):
    """Plain-JAX reference mirroring the PyTorch forward exactly (raw params)."""
    it = iter(raw_params)
    nxt = lambda: (next(it), next(it))
    h = x
    for _ in hidden_before:
        w, b = nxt()
        h = jax.nn.relu(h @ w + b)
    v = h
    for i in range(len(hidden_after) + 1):
        w, b = nxt()
        v = v @ w + b
        if i == 0:
            v = jax.nn.relu(v)
    a = h
    for i in range(len(hidden_after) + 1):
        w, b = nxt()
        a = a @ w + b
        if i == 0:
            a = jax.nn.relu(a)
    B = x.shape[0]
    v = v.reshape(B, 1, num_atoms)
    a = a.reshape(B, num_actions, num_atoms)
    q = v + a - a.mean(1, keepdims=True)
    return jax.nn.softmax(q.reshape(-1, num_atoms), axis=1).reshape(
        B, num_actions, num_atoms)


if __name__ == "__main__":
    # Small, module-consistent shapes.
    batch = 2
    num_inputs = 16
    hidden_before = [32, 32]
    hidden_after = [32]
    num_actions = 4
    num_atoms = 8

    key = jax.random.PRNGKey(0)
    key, kx = jax.random.split(key)
    x = jax.random.normal(kx, (batch, num_inputs), jnp.float32)

    raw = init_params(
        key, num_inputs, hidden_before, hidden_after, num_actions, num_atoms)
    packed = pack_params(
        raw, hidden_before, hidden_after, num_actions, num_atoms, num_inputs)

    out = rainbow_forward(
        x, packed, hidden_before, hidden_after, num_actions, num_atoms)
    out = jax.block_until_ready(out)

    ref = rainbow_forward_ref(
        x, raw, hidden_before, hidden_after, num_actions, num_atoms)

    # The softmax reciprocal is now exact; remaining tolerance covers the fp32
    # summation-order change from the host-side value/advantage + centering
    # fold and XLA-vs-Mosaic f32 matmul pass-decomposition differences.
    np.testing.assert_allclose(np.asarray(out), np.asarray(ref),
                               rtol=2e-3, atol=2e-3)
    assert out.shape == (batch, num_actions, num_atoms)
    assert np.isfinite(np.asarray(out)).all()

    print("KERNEL_OK")
</pallas_src>

<mosaic_0001>
module attributes {stable_mosaic.version = 11 : i64} {
  func.func @kernel(%arg0: i32, %arg1: memref<8x16xf32, #tpu.memory_space<vmem>>, %arg2: memref<16x128xf32, #tpu.memory_space<vmem>>, %arg3: memref<1x128xf32, #tpu.memory_space<vmem>>, %arg4: memref<128x128xf32, #tpu.memory_space<vmem>>, %arg5: memref<1x128xf32, #tpu.memory_space<vmem>>, %arg6: memref<128x128xf32, #tpu.memory_space<vmem>>, %arg7: memref<1x128xf32, #tpu.memory_space<vmem>>, %arg8: memref<128x128xf32, #tpu.memory_space<vmem>>, %arg9: memref<1x128xf32, #tpu.memory_space<vmem>>, %arg10: memref<128x128xf32, #tpu.memory_space<vmem>>, %arg11: memref<8x128xf32, #tpu.memory_space<vmem>>) attributes {dimension_semantics = [#tpu.dimension_semantics<parallel>], iteration_bounds = array<i64: 1>, scalar_prefetch = 0 : i64, scratch_operands = 0 : i64, tpu.core_type = #tpu.core_type<tc>, window_params = [{transform_indices = @transform_0, window_bounds = array<i64: 8, 16>}, {pipeline_mode = #tpu.pipeline_mode<synchronous>, transform_indices = @transform_1, window_bounds = array<i64: 16, 128>}, {pipeline_mode = #tpu.pipeline_mode<synchronous>, transform_indices = @transform_2, window_bounds = array<i64: 1, 128>}, {pipeline_mode = #tpu.pipeline_mode<synchronous>, transform_indices = @transform_3, window_bounds = array<i64: 128, 128>}, {pipeline_mode = #tpu.pipeline_mode<synchronous>, transform_indices = @transform_4, window_bounds = array<i64: 1, 128>}, {pipeline_mode = #tpu.pipeline_mode<synchronous>, transform_indices = @transform_5, window_bounds = array<i64: 128, 128>}, {pipeline_mode = #tpu.pipeline_mode<synchronous>, transform_indices = @transform_6, window_bounds = array<i64: 1, 128>}, {pipeline_mode = #tpu.pipeline_mode<synchronous>, transform_indices = @transform_7, window_bounds = array<i64: 128, 128>}, {pipeline_mode = #tpu.pipeline_mode<synchronous>, transform_indices = @transform_8, window_bounds = array<i64: 1, 128>}, {pipeline_mode = #tpu.pipeline_mode<synchronous>, transform_indices = @transform_9, window_bounds = array<i64: 128, 128>}, {transform_indices = @transform_10, window_bounds = array<i64: 8, 128>}]} {
    %c0 = arith.constant 0 : index
    %c0_0 = arith.constant 0 : index
    %0 = vector.load %arg1[%c0, %c0_0] : memref<8x16xf32, #tpu.memory_space<vmem>>, vector<8x16xf32>
    %c0_1 = arith.constant 0 : index
    %c0_2 = arith.constant 0 : index
    %1 = vector.load %arg2[%c0_1, %c0_2] : memref<16x128xf32, #tpu.memory_space<vmem>>, vector<16x128xf32>
    %c0_3 = arith.constant 0 : index
    %c0_4 = arith.constant 0 : index
    %2 = vector.load %arg3[%c0_3, %c0_4] : memref<1x128xf32, #tpu.memory_space<vmem>>, vector<1x128xf32>
    %cst = arith.constant dense<0.000000e+00> : vector<8x128xf32>
    %3 = tpu.matmul %0, %1, %cst {dimension_numbers = #tpu.dot_dimension_numbers<[1], [0], [0], [1], [0, 0, 1, 1], [], []>} : vector<8x16xf32>, vector<16x128xf32>, vector<8x128xf32> -> vector<8x128xf32>
    %4 = vector.broadcast %2 : vector<1x128xf32> to vector<8x128xf32>
    %5 = arith.addf %3, %4 : vector<8x128xf32>
    %cst_5 = arith.constant 0.000000e+00 : f32
    %6 = vector.broadcast %cst_5 : f32 to vector<8x128xf32>
    %7 = arith.maximumf %5, %6 : vector<8x128xf32>
    %c0_6 = arith.constant 0 : index
    %c0_7 = arith.constant 0 : index
    %8 = vector.load %arg4[%c0_6, %c0_7] : memref<128x128xf32, #tpu.memory_space<vmem>>, vector<128x128xf32>
    %c0_8 = arith.constant 0 : index
    %c0_9 = arith.constant 0 : index
    %9 = vector.load %arg5[%c0_8, %c0_9] : memref<1x128xf32, #tpu.memory_space<vmem>>, vector<1x128xf32>
    %cst_10 = arith.constant dense<0.000000e+00> : vector<8x128xf32>
    %10 = tpu.matmul %7, %8, %cst_10 {dimension_numbers = #tpu.dot_dimension_numbers<[1], [0], [0], [1], [0, 0, 1, 1], [], []>} : vector<8x128xf32>, vector<128x128xf32>, vector<8x128xf32> -> vector<8x128xf32>
    %11 = vector.broadcast %9 : vector<1x128xf32> to vector<8x128xf32>
    %12 = arith.addf %10, %11 : vector<8x128xf32>
    %cst_11 = arith.constant 0.000000e+00 : f32
    %13 = vector.broadcast %cst_11 : f32 to vector<8x128xf32>
    %14 = arith.maximumf %12, %13 : vector<8x128xf32>
    %c0_12 = arith.constant 0 : index
    %c0_13 = arith.constant 0 : index
    %15 = vector.load %arg6[%c0_12, %c0_13] : memref<128x128xf32, #tpu.memory_space<vmem>>, vector<128x128xf32>
    %c0_14 = arith.constant 0 : index
    %c0_15 = arith.constant 0 : index
    %16 = vector.load %arg7[%c0_14, %c0_15] : memref<1x128xf32, #tpu.memory_space<vmem>>, vector<1x128xf32>
    %cst_16 = arith.constant dense<0.000000e+00> : vector<8x128xf32>
    %17 = tpu.matmul %14, %15, %cst_16 {dimension_numbers = #tpu.dot_dimension_numbers<[1], [0], [0], [1], [0, 0, 1, 1], [], []>} : vector<8x128xf32>, vector<128x128xf32>, vector<8x128xf32> -> vector<8x128xf32>
    %18 = vector.broadcast %16 : vector<1x128xf32> to vector<8x128xf32>
    %19 = arith.addf %17, %18 : vector<8x128xf32>
    %cst_17 = arith.constant 0.000000e+00 : f32
    %20 = vector.broadcast %cst_17 : f32 to vector<8x128xf32>
    %21 = arith.maximumf %19, %20 : vector<8x128xf32>
    %c0_18 = arith.constant 0 : index
    %c0_19 = arith.constant 0 : index
    %22 = vector.load %arg8[%c0_18, %c0_19] : memref<128x128xf32, #tpu.memory_space<vmem>>, vector<128x128xf32>
    %c0_20 = arith.constant 0 : index
    %c0_21 = arith.constant 0 : index
    %23 = vector.load %arg9[%c0_20, %c0_21] : memref<1x128xf32, #tpu.memory_space<vmem>>, vector<1x128xf32>
    %c0_22 = arith.constant 0 : index
    %c0_23 = arith.constant 0 : index
    %24 = vector.load %arg10[%c0_22, %c0_23] : memref<128x128xf32, #tpu.memory_space<vmem>>, vector<128x128xf32>
    %cst_24 = arith.constant dense<0.000000e+00> : vector<8x128xf32>
    %25 = tpu.matmul %21, %22, %cst_24 {dimension_numbers = #tpu.dot_dimension_numbers<[1], [0], [0], [1], [0, 0, 1, 1], [], []>} : vector<8x128xf32>, vector<128x128xf32>, vector<8x128xf32> -> vector<8x128xf32>
    %26 = vector.broadcast %23 : vector<1x128xf32> to vector<8x128xf32>
    %27 = arith.addf %25, %26 : vector<8x128xf32>
    %cst_25 = arith.constant dense<0xFF800000> : vector<8xf32>
    %28 = vector.multi_reduction <maximumf>, %27, %cst_25 [1] : vector<8x128xf32> to vector<8xf32>
    %29 = vector.shape_cast %28 : vector<8xf32> to vector<8x1xf32>
    %30 = vector.broadcast %29 : vector<8x1xf32> to vector<8x128xf32>
    %31 = arith.subf %27, %30 : vector<8x128xf32>
    %32 = math.exp %31 : vector<8x128xf32>
    %cst_26 = arith.constant dense<0.000000e+00> : vector<8x128xf32>
    %33 = tpu.matmul %32, %24, %cst_26 {dimension_numbers = #tpu.dot_dimension_numbers<[1], [0], [0], [1], [0, 0, 1, 1], [], []>} : vector<8x128xf32>, vector<128x128xf32>, vector<8x128xf32> -> vector<8x128xf32>
    %cst_27 = arith.constant 1.000000e-30 : f32
    %34 = vector.broadcast %cst_27 : f32 to vector<8x128xf32>
    %35 = arith.maximumf %33, %34 : vector<8x128xf32>
    %36 = tpu.reciprocal %35 : vector<8x128xf32> -> vector<8x128xf32>
    %37 = arith.mulf %32, %36 : vector<8x128xf32>
    %c0_28 = arith.constant 0 : index
    %c0_29 = arith.constant 0 : index
    %38 = vector.load %arg11[%c0_28, %c0_29] : memref<8x128xf32, #tpu.memory_space<vmem>>, vector<8x128xf32>
    tpu.vector_store %arg11[%c0_28, %c0_29], %37 {strides = array<i32>} : memref<8x128xf32, #tpu.memory_space<vmem>>, vector<8x128xf32>,
    return
  }
  func.func @transform_0(%arg0: i32) -> (i32, i32) {
    %c0_i32 = arith.constant 0 : i32
    %c0_i32_0 = arith.constant 0 : i32
    return %arg0, %c0_i32 : i32, i32
  }
  func.func @transform_1(%arg0: i32) -> (i32, i32) {
    %c0_i32 = arith.constant 0 : i32
    %c0_i32_0 = arith.constant 0 : i32
    %c0_i32_1 = arith.constant 0 : i32
    return %c0_i32, %c0_i32_0 : i32, i32
  }
  func.func @transform_2(%arg0: i32) -> (i32, i32) {
    %c0_i32 = arith.constant 0 : i32
    %c0_i32_0 = arith.constant 0 : i32
    %c0_i32_1 = arith.constant 0 : i32
    return %c0_i32, %c0_i32_0 : i32, i32
  }
  func.func @transform_3(%arg0: i32) -> (i32, i32) {
    %c0_i32 = arith.constant 0 : i32
    %c0_i32_0 = arith.constant 0 : i32
    %c0_i32_1 = arith.constant 0 : i32
    return %c0_i32, %c0_i32_0 : i32, i32
  }
  func.func @transform_4(%arg0: i32) -> (i32, i32) {
    %c0_i32 = arith.constant 0 : i32
    %c0_i32_0 = arith.constant 0 : i32
    %c0_i32_1 = arith.constant 0 : i32
    return %c0_i32, %c0_i32_0 : i32, i32
  }
  func.func @transform_5(%arg0: i32) -> (i32, i32) {
    %c0_i32 = arith.constant 0 : i32
    %c0_i32_0 = arith.constant 0 : i32
    %c0_i32_1 = arith.constant 0 : i32
    return %c0_i32, %c0_i32_0 : i32, i32
  }
  func.func @transform_6(%arg0: i32) -> (i32, i32) {
    %c0_i32 = arith.constant 0 : i32
    %c0_i32_0 = arith.constant 0 : i32
    %c0_i32_1 = arith.constant 0 : i32
    return %c0_i32, %c0_i32_0 : i32, i32
  }
  func.func @transform_7(%arg0: i32) -> (i32, i32) {
    %c0_i32 = arith.constant 0 : i32
    %c0_i32_0 = arith.constant 0 : i32
    %c0_i32_1 = arith.constant 0 : i32
    return %c0_i32, %c0_i32_0 : i32, i32
  }
  func.func @transform_8(%arg0: i32) -> (i32, i32) {
    %c0_i32 = arith.constant 0 : i32
    %c0_i32_0 = arith.constant 0 : i32
    %c0_i32_1 = arith.constant 0 : i32
    return %c0_i32, %c0_i32_0 : i32, i32
  }
  func.func @transform_9(%arg0: i32) -> (i32, i32) {
    %c0_i32 = arith.constant 0 : i32
    %c0_i32_0 = arith.constant 0 : i32
    %c0_i32_1 = arith.constant 0 : i32
    return %c0_i32, %c0_i32_0 : i32, i32
  }
  func.func @transform_10(%arg0: i32) -> (i32, i32) {
    %c0_i32 = arith.constant 0 : i32
    %c0_i32_0 = arith.constant 0 : i32
    return %arg0, %c0_i32 : i32, i32
  }
}

</mosaic_0001>

<bundles_post_ra>
// kernel: tpu_custom_call.1
= control target key start
LH: loop header
LB: loop body
LE: loop exit
PB: predicated region body
PF: predicated region fallthrough
CT: control target
= control target key end

     0   :  { %15 = vsyncpa [#allocation3], 0  ;;  %s1173_s0 = inlined_call_operand.hbm [shape: f32[8,16], index: 0, kind: input, shape index: {}]   ;;  %s1174_s1 = inlined_call_operand.hbm [shape: f32[16,128], index: 1, kind: input, shape index: {}]   ;;  %s1175_s2 = inlined_call_operand.vmem [shape: f32[1,128], index: 2, kind: input, shape index: {}]   ;;  %s1176_s3 = inlined_call_operand.hbm [shape: f32[128,128], index: 3, kind: input, shape index: {}]   ;;  %s1177_s4 = inlined_call_operand.vmem [shape: f32[1,128], index: 4, kind: input, shape index: {}]   ;;  %s1178_s5 = inlined_call_operand.hbm [shape: f32[128,128], index: 5, kind: input, shape index: {}]   ;;  %s1179_s6 = inlined_call_operand.vmem [shape: f32[1,128], index: 6, kind: input, shape index: {}]   ;;  %s1180_s7 = inlined_call_operand.hbm [shape: f32[128,128], index: 7, kind: input, shape index: {}]   ;;  %s1181_s8 = inlined_call_operand.vmem [shape: f32[1,128], index: 8, kind: input, shape index: {}]   ;;  %s1182_s9 = inlined_call_operand.hbm [shape: f32[128,128], index: 9, kind: input, shape index: {}]   ;;  %s1183_s10 = inlined_call_operand.hbm [shape: f32[8,128], index: 10, kind: output, shape index: {}]  }
   0x1   :  { %16 = vsyncpa [#allocation6], 0 }
   0x2   :  { %17 = vsyncpa [#allocation9], 0 }
   0x3   :  { %18 = vsyncpa [#allocation12], 0 }
   0x4   :  { %19 = vsyncpa [#allocation4], 0  ;;  %s983_s13 = smov [#allocation5]  }
   0x5   :  { %s35_s14 = sshll.u32 %s983_s13, 4  ;;  %s36_s14 = int_to_ptr.vmem [resolvable:$true] %s35_s14 }
   0x6   :  { %s841_s15 = scalar_lea.vmem %s36_s14, 256  ;;  %p846_p1 = scmp.lt.s32.totalorder %s36_s14, %s36_s14 }
   0x7   :  { %p842_p0 = scmp.ne.s32.totalorder %s36_s14, %s841_s15  ;;  %p847_p2 = scmp.lt.s32.totalorder %s841_s15, %s841_s15 }
   0x9   :  { %p848_p3 = por %p847_p2, %p846_p1 }
   0xb   :  { %p849_p4 = pnand %p848_p3, %p842_p0 }
   0xd   :  { %852 = shalt.err (!%p849_p4)
}
   0xe   :  { %s984_s16 = smov 128   ;;  %s985_s17 = smov 8  }
   0xf   :  { %41 = dma.hbm_to_vmem [thread:$0]  %s1174_s1, 256, %s36_s14, [#allocation6], %s984_s16, %s984_s16, %s985_s17  }
  0x10   :  { %s986_s20 = smov [#allocation8]   ;;  %s987_s22 = smov [#allocation2]  }
  0x11   :  { %s63_s21 = sshll.u32 %s986_s20, 4  ;;  %s26_s23 = sshll.u32 %s987_s22, 4  ;;  %s64_s21 = int_to_ptr.vmem [resolvable:$true] %s63_s21  ;;  %s27_s23 = int_to_ptr.vmem [resolvable:$true] %s26_s23 }
  0x12   :  { %s861_s24 = scalar_lea.vmem %s64_s21, 2048  ;;  %p866_p6 = scmp.lt.s32.totalorder %s64_s21, %s64_s21 }
  0x13   :  { %p862_p5 = scmp.ne.s32.totalorder %s64_s21, %s861_s24  ;;  %p867_p7 = scmp.lt.s32.totalorder %s861_s24, %s861_s24 }
  0x15   :  { %p868_p8 = por %p867_p7, %p866_p6 }
  0x17   :  { %p869_p9 = pnand %p868_p8, %p862_p5 }
  0x19   :  { %872 = shalt.err (!%p869_p9)
}
  0x1a   :  { %69 = dma.hbm_to_vmem [thread:$0]  %s1178_s5, 2048, %s64_s21, [#allocation9], %s984_s16, %s984_s16, %s985_s17  }
  0x1b   :  { %s881_s1 = scalar_lea.vmem %s27_s23, 128  ;;  %p886_p11 = scmp.lt.s32.totalorder %s27_s23, %s27_s23 }
  0x1c   :  { %p882_p10 = scmp.ne.s32.totalorder %s27_s23, %s881_s1  ;;  %p887_p12 = scmp.lt.s32.totalorder %s881_s1, %s881_s1 }
  0x1e   :  { %p888_p13 = por %p887_p12, %p886_p11 }
  0x20   :  { %p889_p0 = pnand %p888_p13, %p882_p10 }
  0x22   :  { %892 = shalt.err (!%p889_p0)
}
  0x23   :  { %29 = dma.hbm_to_vmem [thread:$0]  %s1173_s0, 128, %s27_s23, [#allocation3]  }
  0x24   :  { %s988_s29 = smov [#allocation7]   ;;  %s989_s11 = smov [#allocation10]  }
  0x25   :  { %s49_s30 = sshll.u32 %s988_s29, 4  ;;  %s77_s12 = sshll.u32 %s989_s11, 4  ;;  %s50_s30 = int_to_ptr.vmem [resolvable:$true] %s49_s30  ;;  %s78_s12 = int_to_ptr.vmem [resolvable:$true] %s77_s12 }
  0x26   :  { %s901_s13 = scalar_lea.vmem %s50_s30, 2048  ;;  %p906_p2 = scmp.lt.s32.totalorder %s50_s30, %s50_s30 }
  0x27   :  { %p902_p1 = scmp.ne.s32.totalorder %s50_s30, %s901_s13  ;;  %p907_p3 = scmp.lt.s32.totalorder %s901_s13, %s901_s13 }
  0x29   :  { %p908_p4 = por %p907_p3, %p906_p2 }
  0x2b   :  { %p909_p5 = pnand %p908_p4, %p902_p1 }
  0x2d   :  { %912 = shalt.err (!%p909_p5)
}
  0x2e   :  { %55 = dma.hbm_to_vmem [thread:$0]  %s1176_s3, 2048, %s50_s30, [#allocation6], %s984_s16, %s984_s16, %s985_s17  }
  0x2f   :  { %s921_s0 = scalar_lea.vmem %s78_s12, 2048  ;;  %p926_p7 = scmp.lt.s32.totalorder %s78_s12, %s78_s12 }
  0x30   :  { %p922_p6 = scmp.ne.s32.totalorder %s78_s12, %s921_s0  ;;  %p927_p8 = scmp.lt.s32.totalorder %s921_s0, %s921_s0 }
  0x32   :  { %p928_p9 = por %p927_p8, %p926_p7 }
  0x34   :  { %p929_p10 = pnand %p928_p9, %p922_p6 }
  0x36   :  { %932 = shalt.err (!%p929_p10)
}
  0x37   :  { %83 = dma.hbm_to_vmem [thread:$0]  %s1180_s7, 2048, %s78_s12, [#allocation9], %s984_s16, %s984_s16, %s985_s17  }
  0x38   :  { %s990_s19 = smov [#allocation11]  }
  0x39   :  { %s91_s20 = sshll.u32 %s990_s19, 4  ;;  %s92_s20 = int_to_ptr.vmem [resolvable:$true] %s91_s20 }
  0x3a   :  { %s941_s21 = scalar_lea.vmem %s92_s20, 2048  ;;  %p946_p12 = scmp.lt.s32.totalorder %s92_s20, %s92_s20 }
  0x3b   :  { %p942_p11 = scmp.ne.s32.totalorder %s92_s20, %s941_s21  ;;  %p947_p13 = scmp.lt.s32.totalorder %s941_s21, %s941_s21 }
  0x3d   :  { %p948_p0 = por %p947_p13, %p946_p12 }
  0x3f   :  { %p949_p1 = pnand %p948_p0, %p942_p11 }
  0x41   :  { %952 = shalt.err (!%p949_p1)
}
  0x42   :  { %97 = dma.hbm_to_vmem [thread:$0]  %s1182_s9, 2048, %s92_s20, [#allocation12], %s984_s16, %s984_s16, %s985_s17  }
  0x43   :  { %973 = dma.done.wait [#allocation3], 128  }
  0x44   :  { %974 = vsyncadd [#allocation3], 4294967168 }
  0x45   :  { %975 = dma.done.wait [#allocation6], 2304  }
  0x46   :  { %976 = vsyncadd [#allocation6], 4294964992 }
  0x47   :  { %977 = dma.done.wait [#allocation9], 4096  }
  0x48   :  { %978 = vsyncadd [#allocation9], 4294963200 }
  0x49   :  { %979 = dma.done.wait [#allocation12], 2048  }
  0x4a   :  { %980 = vsyncadd [#allocation12], 4294965248  ;;  %v991_v0 = vmov 0.0   ;;  %vm992_vm0 = vmmov 0   ;;  %v118_v1 = vld [vmem:[#allocation5 + $0x8] sm:$0xff]  ;;  %v117_v2 = vld [vmem:[#allocation5] sm:$0xff] }
  0x4b   :  { %671 = vmatprep.subr.mxu0 %v991_v0  ;;  %675 = vmatprep.mubr.msk.f32.mxu0 %vm992_vm0, %v991_v0  ;;  %v116_v3 = vld [vmem:[#allocation2] sm:$0xff]  ;;  %vm126_vm1 = vcmask 130048   ;;  %v216_v4 = vld [vmem:[#allocation7 + $0x78] sm:$0xff]  ;;  %v215_v5 = vld [vmem:[#allocation7 + $0x70] sm:$0xff] }
  0x4c   :  { %678 = vmatprep.subr.mxu1 %v991_v0  ;;  %710 = vmatprep.mubr.msk.f32.mxu1 %vm992_vm0, %v991_v0  ;;  %v214_v6 = vld [vmem:[#allocation7 + $0x68] sm:$0xff]  ;;  %v213_v7 = vld [vmem:[#allocation7 + $0x60] sm:$0xff]  ;;  %v212_v8 = vld [vmem:[#allocation7 + $0x58] sm:$0xff] }
  0x4d   :  { %672 = vmatpush3.msra.mxu0 %v118_v1  ;;  %679 = vmatpush3.msra.mxu1 %v216_v4  ;;  %v211_v9 = vld [vmem:[#allocation7 + $0x50] sm:$0xff]  ;;  %v210_v10 = vld [vmem:[#allocation7 + $0x48] sm:$0xff]  ;;  %v209_v11 = vld [vmem:[#allocation7 + $0x40] sm:$0xff] }
  0x4e   :  { %673 = vmatprep.subr.mxu0 %v991_v0  ;;  %680 = vmatprep.subr.mxu1 %v991_v0  ;;  %v208_v12 = vld [vmem:[#allocation7 + $0x38] sm:$0xff]  ;;  %v207_v13 = vld [vmem:[#allocation7 + $0x30] sm:$0xff]  ;;  %v206_v14 = vld [vmem:[#allocation7 + $0x28] sm:$0xff] }
  0x4f   :  { %674 = vmatpush3.msra.mxu0 %v117_v2  ;;  %681 = vmatpush3.msra.mxu1 %v215_v5  ;;  %v205_v15 = vld [vmem:[#allocation7 + $0x20] sm:$0xff]  ;;  %v204_v16 = vld [vmem:[#allocation7 + $0x18] sm:$0xff]  ;;  %v203_v17 = vld [vmem:[#allocation7 + $0x10] sm:$0xff] }
  0x50   :  { %676 = vmatmul.mubr.msk.f32.vlgmr.msra.gmra.mxu0 %vm126_vm1, %v116_v3  ;;  %682 = vmatprep.subr.mxu1 %v991_v0  ;;  %v202_v18 = vld [vmem:[#allocation7 + $0x8] sm:$0xff]  ;;  %v201_v19 = vld [vmem:[#allocation7] sm:$0xff]  ;;  %v310_v20 = vld [vmem:[#allocation8 + $0x78] sm:$0xff] }
  0x51   :  { %713 = vmatprep.subr.mxu0 %v991_v0  ;;  %683 = vmatpush3.msra.mxu1 %v214_v6  ;;  %v309_v21 = vld [vmem:[#allocation8 + $0x70] sm:$0xff]  ;;  %v308_v22 = vld [vmem:[#allocation8 + $0x68] sm:$0xff]  ;;  %v307_v23 = vld [vmem:[#allocation8 + $0x60] sm:$0xff] }
  0x52   :  { %745 = vmatprep.mubr.msk.f32.mxu0 %vm992_vm0, %v991_v0  ;;  %684 = vmatprep.subr.mxu1 %v991_v0  ;;  %v306_v24 = vld [vmem:[#allocation8 + $0x58] sm:$0xff]  ;;  %v305_v25 = vld [vmem:[#allocation8 + $0x50] sm:$0xff]  ;;  %v304_v26 = vld [vmem:[#allocation8 + $0x48] sm:$0xff] }
  0x53   :  { %685 = vmatpush3.msra.mxu1 %v213_v7  ;;  %714 = vmatpush3.msra.mxu0 %v310_v20  ;;  %v303_v27 = vld [vmem:[#allocation8 + $0x40] sm:$0xff]  ;;  %v302_v28 = vld [vmem:[#allocation8 + $0x38] sm:$0xff]  ;;  %v301_v29 = vld [vmem:[#allocation8 + $0x30] sm:$0xff] }
  0x54   :  { %686 = vmatprep.subr.mxu1 %v991_v0  ;;  %715 = vmatprep.subr.mxu0 %v991_v0  ;;  %v300_v30 = vld [vmem:[#allocation8 + $0x28] sm:$0xff]  ;;  %v299_v31 = vld [vmem:[#allocation8 + $0x20] sm:$0xff]  ;;  %v298_v32 = vld [vmem:[#allocation8 + $0x18] sm:$0xff] }
  0x55   :  { %687 = vmatpush3.msra.mxu1 %v212_v8  ;;  %716 = vmatpush3.msra.mxu0 %v309_v21  ;;  %v595_v33 = vld [vmem:[%s1175_s2] ss:$0 sm:$0xff]  ;;  %v297_v38 = vld [vmem:[#allocation8 + $0x10] sm:$0xff]  ;;  %v295_v40 = vld [vmem:[#allocation8] sm:$0xff] }
  0x56   :  { %688 = vmatprep.subr.mxu1 %v991_v0  ;;  %717 = vmatprep.subr.mxu0 %v991_v0  ;;  %v296_v39 = vld [vmem:[#allocation8 + $0x8] sm:$0xff]  ;;  %v404_v41 = vld [vmem:[#allocation10 + $0x78] sm:$0xff]  ;;  %v403_v42 = vld [vmem:[#allocation10 + $0x70] sm:$0xff] }
  0x57   :  { %689 = vmatpush3.msra.mxu1 %v211_v9  ;;  %718 = vmatpush3.msra.mxu0 %v308_v22  ;;  %v402_v43 = vld [vmem:[#allocation10 + $0x68] sm:$0xff]  ;;  %v401_v44 = vld [vmem:[#allocation10 + $0x60] sm:$0xff]  ;;  %v400_v45 = vld [vmem:[#allocation10 + $0x58] sm:$0xff] }
  0x58   :  { %690 = vmatprep.subr.mxu1 %v991_v0  ;;  %719 = vmatprep.subr.mxu0 %v991_v0  ;;  %v399_v46 = vld [vmem:[#allocation10 + $0x50] sm:$0xff]  ;;  %v398_v47 = vld [vmem:[#allocation10 + $0x48] sm:$0xff]  ;;  %v397_v48 = vld [vmem:[#allocation10 + $0x40] sm:$0xff] }
  0x59   :  { %691 = vmatpush3.msra.mxu1 %v210_v10  ;;  %720 = vmatpush3.msra.mxu0 %v307_v23  ;;  %v396_v49 = vld [vmem:[#allocation10 + $0x38] sm:$0xff]  ;;  %v395_v50 = vld [vmem:[#allocation10 + $0x30] sm:$0xff]  ;;  %v394_v51 = vld [vmem:[#allocation10 + $0x28] sm:$0xff] }
  0x5a   :  { %692 = vmatprep.subr.mxu1 %v991_v0  ;;  %721 = vmatprep.subr.mxu0 %v991_v0  ;;  %v393_v52 = vld [vmem:[#allocation10 + $0x20] sm:$0xff]  ;;  %v392_v53 = vld [vmem:[#allocation10 + $0x18] sm:$0xff]  ;;  %v597_v54 = vld [vmem:[%s1177_s4] ss:$0 sm:$0xff] }
  0x5b   :  { %693 = vmatpush3.msra.mxu1 %v209_v11  ;;  %722 = vmatpush3.msra.mxu0 %v306_v24  ;;  %v391_v59 = vld [vmem:[#allocation10 + $0x10] sm:$0xff]  ;;  %v390_v60 = vld [vmem:[#allocation10 + $0x8] sm:$0xff]  ;;  %v389_v61 = vld [vmem:[#allocation10] sm:$0xff] }
  0x5c   :  { %694 = vmatprep.subr.mxu1 %v991_v0  ;;  %723 = vmatprep.subr.mxu0 %v991_v0  ;;  %v598_v62 = vld [vmem:[%s1179_s6] ss:$0 sm:$0xff]  ;;  %v421_v4 = vld [vmem:[#allocation11 + $0x78] sm:$0xff]  ;;  %v420_v5 = vld [vmem:[#allocation11 + $0x70] sm:$0xff] }
  0x5d   :  { %695 = vmatpush3.msra.mxu1 %v208_v12  ;;  %724 = vmatpush3.msra.mxu0 %v305_v25  ;;  %v419_v6 = vld [vmem:[#allocation11 + $0x68] sm:$0xff]  ;;  %v418_v7 = vld [vmem:[#allocation11 + $0x60] sm:$0xff]  ;;  %v417_v8 = vld [vmem:[#allocation11 + $0x58] sm:$0xff] }
  0x5e   :  { %696 = vmatprep.subr.mxu1 %v991_v0  ;;  %725 = vmatprep.subr.mxu0 %v991_v0  ;;  %v416_v9 = vld [vmem:[#allocation11 + $0x50] sm:$0xff]  ;;  %v599_v10 = vld [vmem:[%s1181_s8] ss:$0 sm:$0xff]  ;;  %v409_v20 = vld [vmem:[#allocation11 + $0x18] sm:$0xff]  ;;  %s993_s8 = smov [#allocation13]  }
  0x5f   :  { %697 = vmatpush3.msra.mxu1 %v207_v13  ;;  %726 = vmatpush3.msra.mxu0 %v304_v26  ;;  %v408_v21 = vld [vmem:[#allocation11 + $0x10] sm:$0xff]  ;;  %v407_v22 = vld [vmem:[#allocation11 + $0x8] sm:$0xff]  ;;  %v406_v23 = vld [vmem:[#allocation11] sm:$0xff]  ;;  %s583_s24 = sshll.u32 %s993_s8, 4  ;;  %s584_s24 = int_to_ptr.vmem [resolvable:$true] %s583_s24 }
  0x60   :  { %698 = vmatprep.subr.mxu1 %v991_v0  ;;  %727 = vmatprep.subr.mxu0 %v991_v0  ;;  %s953_s25 = scalar_lea.vmem %s584_s24, 128  ;;  %p958_p3 = scmp.lt.s32.totalorder %s584_s24, %s584_s24 }
  0x61   :  { %699 = vmatpush3.msra.mxu1 %v206_v14  ;;  %728 = vmatpush3.msra.mxu0 %v303_v27  ;;  %v415_v14 = vld [vmem:[#allocation11 + $0x48] sm:$0xff]  ;;  %p954_p2 = scmp.ne.s32.totalorder %s584_s24, %s953_s25  ;;  %p959_p4 = scmp.lt.s32.totalorder %s953_s25, %s953_s25 }
  0x62   :  { %700 = vmatprep.subr.mxu1 %v991_v0  ;;  %729 = vmatprep.subr.mxu0 %v991_v0 }
  0x63   :  { %701 = vmatpush3.msra.mxu1 %v205_v15  ;;  %730 = vmatpush3.msra.mxu0 %v302_v28  ;;  %v414_v15 = vld [vmem:[#allocation11 + $0x40] sm:$0xff]  ;;  %p960_p5 = por %p959_p4, %p958_p3 }
  0x64   :  { %702 = vmatprep.subr.mxu1 %v991_v0  ;;  %731 = vmatprep.subr.mxu0 %v991_v0 }
  0x65   :  { %703 = vmatpush3.msra.mxu1 %v204_v16  ;;  %732 = vmatpush3.msra.mxu0 %v301_v29  ;;  %v413_v16 = vld [vmem:[#allocation11 + $0x38] sm:$0xff]  ;;  %p961_p6 = pnand %p960_p5, %p954_p2 }
  0x66   :  { %704 = vmatprep.subr.mxu1 %v991_v0  ;;  %733 = vmatprep.subr.mxu0 %v991_v0 }
  0x67   :  { %705 = vmatpush3.msra.mxu1 %v203_v17  ;;  %734 = vmatpush3.msra.mxu0 %v300_v30  ;;  %v412_v17 = vld [vmem:[#allocation11 + $0x30] sm:$0xff] }
  0x68   :  { %706 = vmatprep.subr.mxu1 %v991_v0  ;;  %735 = vmatprep.subr.mxu0 %v991_v0 }
  0x69   :  { %707 = vmatpush3.msra.mxu1 %v202_v18  ;;  %736 = vmatpush3.msra.mxu0 %v299_v31  ;;  %v411_v18 = vld [vmem:[#allocation11 + $0x28] sm:$0xff] }
  0x6a   :  { %708 = vmatprep.subr.mxu1 %v991_v0  ;;  %737 = vmatprep.subr.mxu0 %v991_v0 }
  0x6b   :  { %709 = vmatpush3.msra.mxu1 %v201_v19  ;;  %738 = vmatpush3.msra.mxu0 %v298_v32  ;;  %v410_v19 = vld [vmem:[#allocation11 + $0x20] sm:$0xff] }
  0x6c   :  { %748 = vmatprep.subr.mxu1 %v991_v0  ;;  %739 = vmatprep.subr.mxu0 %v991_v0 }
  0x6d   :  { %740 = vmatpush3.msra.mxu0 %v297_v38 }
  0x6e   :  { %741 = vmatprep.subr.mxu0 %v991_v0 }
  0x6f   :  { %742 = vmatpush3.msra.mxu0 %v296_v39 }
  0x70   :  { %743 = vmatprep.subr.mxu0 %v991_v0 }
  0x71   :  { %744 = vmatpush3.msra.mxu0 %v295_v40 }
  0x72   :  { %783 = vmatprep.subr.mxu0 %v991_v0 }
 0x110   :  { %v196_v34 = vpop.f32.mrf.mxu0 }
 0x111   :  { %v197_v35 = vadd.f32 %v595_v33, %v196_v34 }
 0x112   :  { %v677_v36 = vpop.f32.mrf.mxu0 }
 0x113   :  { %v200_v37 = vmax.f32 %v197_v35, 0.0 }
 0x115   :  { %711 = vmatmul.mubr.f32.vlgmr.msra.gmra.mxu1 %v200_v37 }
 0x116   :  { %780 = vmatprep.mubr.msk.f32.mxu1 %vm992_vm0, %v991_v0  ;;  %749 = vmatpush3.msra.mxu1 %v404_v41 }
 0x117   :  { %750 = vmatprep.subr.mxu1 %v991_v0 }
 0x118   :  { %751 = vmatpush3.msra.mxu1 %v403_v42 }
 0x119   :  { %752 = vmatprep.subr.mxu1 %v991_v0 }
 0x11a   :  { %753 = vmatpush3.msra.mxu1 %v402_v43 }
 0x11b   :  { %754 = vmatprep.subr.mxu1 %v991_v0 }
 0x11c   :  { %755 = vmatpush3.msra.mxu1 %v401_v44 }
 0x11d   :  { %756 = vmatprep.subr.mxu1 %v991_v0 }
 0x11e   :  { %757 = vmatpush3.msra.mxu1 %v400_v45 }
 0x11f   :  { %758 = vmatprep.subr.mxu1 %v991_v0 }
 0x120   :  { %759 = vmatpush3.msra.mxu1 %v399_v46 }
 0x121   :  { %760 = vmatprep.subr.mxu1 %v991_v0 }
 0x122   :  { %761 = vmatpush3.msra.mxu1 %v398_v47 }
 0x123   :  { %762 = vmatprep.subr.mxu1 %v991_v0 }
 0x124   :  { %763 = vmatpush3.msra.mxu1 %v397_v48 }
 0x125   :  { %764 = vmatprep.subr.mxu1 %v991_v0 }
 0x126   :  { %765 = vmatpush3.msra.mxu1 %v396_v49 }
 0x127   :  { %766 = vmatprep.subr.mxu1 %v991_v0 }
 0x128   :  { %767 = vmatpush3.msra.mxu1 %v395_v50 }
 0x129   :  { %768 = vmatprep.subr.mxu1 %v991_v0 }
 0x12a   :  { %769 = vmatpush3.msra.mxu1 %v394_v51 }
 0x12b   :  { %770 = vmatprep.subr.mxu1 %v991_v0 }
 0x12c   :  { %771 = vmatpush3.msra.mxu1 %v393_v52 }
 0x12d   :  { %772 = vmatprep.subr.mxu1 %v991_v0 }
 0x12e   :  { %773 = vmatpush3.msra.mxu1 %v392_v53 }
 0x12f   :  { %774 = vmatprep.subr.mxu1 %v991_v0 }
 0x130   :  { %775 = vmatpush3.msra.mxu1 %v391_v59 }
 0x131   :  { %776 = vmatprep.subr.mxu1 %v991_v0 }
 0x132   :  { %777 = vmatpush3.msra.mxu1 %v390_v60 }
 0x133   :  { %778 = vmatprep.subr.mxu1 %v991_v0 }
 0x134   :  { %779 = vmatpush3.msra.mxu1 %v389_v61 }
 0x1d5   :  { %v290_v55 = vpop.f32.mrf.mxu1 }
 0x1d6   :  { %v291_v56 = vadd.f32 %v597_v54, %v290_v55 }
 0x1d7   :  { %v712_v57 = vpop.f32.mrf.mxu1 }
 0x1d8   :  { %v294_v58 = vmax.f32 %v291_v56, 0.0 }
 0x1da   :  { %746 = vmatmul.mubr.f32.vlgmr.msra.gmra.mxu0 %v294_v58 }
 0x1db   :  { %815 = vmatprep.mubr.msk.f32.mxu0 %vm992_vm0, %v991_v0  ;;  %784 = vmatpush3.msra.mxu0 %v421_v4 }
 0x1dc   :  { %785 = vmatprep.subr.mxu0 %v991_v0 }
 0x1dd   :  { %786 = vmatpush3.msra.mxu0 %v420_v5 }
 0x1de   :  { %787 = vmatprep.subr.mxu0 %v991_v0 }
 0x1df   :  { %788 = vmatpush3.msra.mxu0 %v419_v6 }
 0x1e0   :  { %789 = vmatprep.subr.mxu0 %v991_v0 }
 0x1e1   :  { %790 = vmatpush3.msra.mxu0 %v418_v7 }
 0x1e2   :  { %791 = vmatprep.subr.mxu0 %v991_v0 }
 0x1e3   :  { %792 = vmatpush3.msra.mxu0 %v417_v8 }
 0x1e4   :  { %793 = vmatprep.subr.mxu0 %v991_v0 }
 0x1e5   :  { %794 = vmatpush3.msra.mxu0 %v416_v9 }
 0x1e6   :  { %795 = vmatprep.subr.mxu0 %v991_v0 }
 0x1e7   :  { %796 = vmatpush3.msra.mxu0 %v415_v14 }
 0x1e8   :  { %797 = vmatprep.subr.mxu0 %v991_v0 }
 0x1e9   :  { %798 = vmatpush3.msra.mxu0 %v414_v15 }
 0x1ea   :  { %799 = vmatprep.subr.mxu0 %v991_v0 }
 0x1eb   :  { %800 = vmatpush3.msra.mxu0 %v413_v16 }
 0x1ec   :  { %801 = vmatprep.subr.mxu0 %v991_v0 }
 0x1ed   :  { %802 = vmatpush3.msra.mxu0 %v412_v17 }
 0x1ee   :  { %803 = vmatprep.subr.mxu0 %v991_v0 }
 0x1ef   :  { %804 = vmatpush3.msra.mxu0 %v411_v18 }
 0x1f0   :  { %805 = vmatprep.subr.mxu0 %v991_v0 }
 0x1f1   :  { %806 = vmatpush3.msra.mxu0 %v410_v19 }
 0x1f2   :  { %807 = vmatprep.subr.mxu0 %v991_v0 }
 0x1f3   :  { %808 = vmatpush3.msra.mxu0 %v409_v20 }
 0x1f4   :  { %809 = vmatprep.subr.mxu0 %v991_v0 }
 0x1f5   :  { %810 = vmatpush3.msra.mxu0 %v408_v21 }
 0x1f6   :  { %811 = vmatprep.subr.mxu0 %v991_v0 }
 0x1f7   :  { %812 = vmatpush3.msra.mxu0 %v407_v22 }
 0x1f8   :  { %813 = vmatprep.subr.mxu0 %v991_v0 }
 0x1f9   :  { %814 = vmatpush3.msra.mxu0 %v406_v23 }
 0x29a   :  { %v384_v63 = vpop.f32.mrf.mxu0 }
 0x29b   :  { %v385_v1 = vadd.f32 %v598_v62, %v384_v63 }
 0x29c   :  { %v747_v2 = vpop.f32.mrf.mxu0 }
 0x29d   :  { %v388_v3 = vmax.f32 %v385_v1, 0.0 }
 0x29f   :  { %781 = vmatmul.mubr.f32.vlgmr.msra.gmra.mxu1 %v388_v3 }
 0x35f   :  { %v494_v11 = vpop.f32.mrf.mxu1 }
 0x360   :  { %v495_v12 = vadd.f32 %v599_v10, %v494_v11 }
 0x361   :  { %v782_v13 = vpop.f32.mrf.mxu1 }
 0x362   :  { %498 = vmax.xlane.f32.xlu0 %v495_v12 }
 0x3eb   :  { %v499_v24 = vpop.xlane.xlu0 %498 }
 0x3ec   :  { %v500_v25 = vsub.f32 %v495_v12, %v499_v24 }
 0x3ee   :  { %v501_v26 = vmul.f32 1.442695, %v500_v25 }
 0x3f0   :  { %829 = vpow2.f32 %v501_v26 }
 0x3fd   :  { %v830_v27 = vpop.eup %829 }
 0x3fe   :  { %816 = vmatmul.mubr.f32.vlgmr.msra.gmra.mxu0 %v830_v27 }
 0x4be   :  { %v569_v28 = vpop.f32.mrf.mxu0 }
 0x4bf   :  { %v573_v29 = vmax.f32 %v569_v28, 1e-30 }
 0x4c0   :  { %v817_v30 = vpop.f32.mrf.mxu0 }
 0x4c1   :  { %831 = vrcp.f32 %v573_v29 }
 0x4ce   :  { %v832_v31 = vpop.eup %831 }
 0x4cf   :  { %v575_v32 = vmul.f32 %v832_v31, %v830_v27 }
 0x4d1   :  { %576 = vst [vmem:[#allocation13] sm:$0xff] %v575_v32 }
 0x4d2   :  { %964 = shalt.err (!%p961_p6)
}
 0x4d3   :  { %586 = dma.vmem_to_hbm [thread:$0]  %s584_s24, 128, %s1183_s10, [#allocation4]  }
 0x4d4   :  { %981 = dma.done.wait [#allocation4], 128  }
 0x4d5   :  { %982 = vsyncadd [#allocation4], 4294967168 }
 0x4d6   :  { %590 = vsyncpa [#allocation3], 1 }
 0x4d7   :  { %591 = vsyncpa [#allocation6], 1 }
 0x4d8   :  { %592 = vsyncpa [#allocation9], 1 }
 0x4d9   :  { %593 = vsyncpa [#allocation12], 1 }
 0x4da   :  { %594 = vsyncpa [#allocation4], 1 }

</bundles_post_ra>
